<compile_context>
chip_gen: v6e
topology: v6e:2x2x1
jax: 0.10.0
libtpu: 0.0.40
codegen_flags: <defaults>
</compile_context>

<pallas_src>
import functools

import jax
import jax.numpy as jnp
from jax import lax
from jax.experimental import pallas as pl
from jax.experimental.pallas import tpu as pltpu

# Contract last dim of LHS with last dim of RHS (i.e. x @ W.T without materializing W.T).
_TRANS_B = (((1,), (1,)), ((), ()))
_LANE = 128


def _round_up(x, m):
    return ((x + m - 1) // m) * m


# -----------------------------------------------------------------------------
# Kernels
# -----------------------------------------------------------------------------
def _generator_kernel(small_ref, ew_ref, gw_ref, out_ref, *, insize, z_dim, outsize):
    # small_ref: (8, L) f32 packed small operands (one DMA instead of four):
    #   row 0: task_context (insize lanes)   row 1: z_signal (z_dim lanes)
    #   row 2: encoder bias (2*z_dim lanes)  row 3: gen bias (outsize lanes)
    # ew_ref : (2*z_dim, insize)  encoder weight, PyTorch (out, in) layout
    # gw_ref : (outsize, z_dim)   gen weight, PyTorch (out, in) layout
    # out_ref: (1, outsize)       normalized generated weight (lane-dense)
    x = small_ref[0:1, :insize]
    zs = small_ref[1:2, :z_dim]
    eb = small_ref[2:3, :2 * z_dim]
    gb = small_ref[3:4, :outsize]

    # Fused encoder matmul: one MXU pass for dist = x @ enc_w.T + enc_b.
    dist = lax.dot_general(
        x.astype(ew_ref.dtype), ew_ref[...], _TRANS_B,
        preferred_element_type=jnp.float32) + eb
    mu = dist[:, :z_dim]
    log_var = dist[:, z_dim:]

    # Reparameterization: z = mu + exp(log_var / 2) * z_signal (kept in f32).
    z = mu + jnp.exp(log_var * 0.5) * zs

    # gen: w = z @ gen_w.T + gen_b (f32 accumulation regardless of weight dtype).
    w = lax.dot_general(
        z.astype(gw_ref.dtype), gw_ref[...], _TRANS_B,
        preferred_element_type=jnp.float32) + gb

    # L2-normalize with EUP rsqrt + VPU multiply (no vector divide).
    out_ref[...] = (w * lax.rsqrt(jnp.sum(w * w))).astype(out_ref.dtype)


def _generator_batched_kernel(x_ref, zs_ref, bias_ref, ew_ref, gw_ref, out_ref,
                              *, z_dim, outsize):
    # x_ref: (tb, insize), zs_ref: (tb, z_dim); bias_ref rows 2/3 = enc/gen bias.
    eb = bias_ref[2:3, :2 * z_dim]
    gb = bias_ref[3:4, :outsize]

    dist = lax.dot_general(
        x_ref[...].astype(ew_ref.dtype), ew_ref[...], _TRANS_B,
        preferred_element_type=jnp.float32) + eb
    mu = dist[:, :z_dim]
    log_var = dist[:, z_dim:]
    z = mu + jnp.exp(log_var * 0.5) * zs_ref[...]

    w = lax.dot_general(
        z.astype(gw_ref.dtype), gw_ref[...], _TRANS_B,
        preferred_element_type=jnp.float32) + gb

    # Each row is an independent generated weight -> per-row L2 normalization.
    inv_norm = lax.rsqrt(jnp.sum(w * w, axis=-1, keepdims=True))
    out_ref[...] = (w * inv_norm).astype(out_ref.dtype)


# -----------------------------------------------------------------------------
# One-time parameter preparation (hoisted out of the per-call hot path)
# -----------------------------------------------------------------------------
def prepare_generator_params(enc_w, enc_b, gen_w, gen_b, *, weights_dtype=jnp.float32):
    """Pre-shape / pre-cast parameters once at load time.

    Returns (enc_w, gen_w, small_template): weights cast to weights_dtype (bf16 on
    v6e/v7x for the MXU fast path, f32 for bit-exactness) and an (8, L) f32 buffer
    with the encoder bias in row 2 and the gen bias in row 3. Rows 0/1 are filled
    per call with the task context and z_signal.
    """
    two_z, insize = enc_w.shape
    outsize, z_dim = gen_w.shape
    assert two_z == 2 * z_dim
    lanes = _round_up(max(insize, outsize, 2 * z_dim, _LANE), _LANE)
    tmpl = jnp.zeros((8, lanes), jnp.float32)
    tmpl = tmpl.at[2, :2 * z_dim].set(enc_b.reshape(2 * z_dim).astype(jnp.float32))
    tmpl = tmpl.at[3, :outsize].set(gen_b.reshape(outsize).astype(jnp.float32))
    return (jnp.asarray(enc_w, weights_dtype), jnp.asarray(gen_w, weights_dtype), tmpl)


# -----------------------------------------------------------------------------
# Forward passes
# -----------------------------------------------------------------------------
@jax.jit
def generator_forward(task_context, z_signal, enc_w, gen_w, small_template):
    """Module-faithful single-context forward. task_context: (insize,), z_signal: (1, z_dim)."""
    insize = enc_w.shape[1]
    outsize, z_dim = gen_w.shape

    # Per call: drop context + noise into rows 0/1 of the prebaked packed buffer
    # (one tiny fused update; 3 input DMAs total into the kernel).
    small = small_template.at[0, :insize].set(
        task_context.reshape(insize).astype(jnp.float32))
    small = small.at[1, :z_dim].set(z_signal.reshape(z_dim).astype(jnp.float32))

    kernel = functools.partial(
        _generator_kernel, insize=insize, z_dim=z_dim, outsize=outsize)
    w_bytes = (enc_w.size * enc_w.dtype.itemsize + gen_w.size * gen_w.dtype.itemsize)
    cost = pl.CostEstimate(
        flops=2 * insize * 2 * z_dim + 2 * z_dim * outsize,
        transcendentals=z_dim + 1,
        bytes_accessed=w_bytes + small.size * 4 + outsize * 4)

    vmem = pl.BlockSpec(memory_space=pltpu.MemorySpace.VMEM)
    return pl.pallas_call(
        kernel,
        out_shape=jax.ShapeDtypeStruct((1, outsize), jnp.float32),
        in_specs=[vmem, vmem, vmem],
        out_specs=vmem,
        cost_estimate=cost,
    )(small, enc_w, gen_w)


@functools.partial(jax.jit, static_argnames=("block_b",))
def generator_forward_batched(task_contexts, z_signals, enc_w, gen_w, small_template,
                              *, block_b=8):
    """Batched variant: B independent task contexts / noise rows, grid over B-tiles."""
    B, insize = task_contexts.shape
    outsize, z_dim = gen_w.shape
    assert B % block_b == 0

    kernel = functools.partial(_generator_batched_kernel, z_dim=z_dim, outsize=outsize)
    w_bytes = (enc_w.size * enc_w.dtype.itemsize + gen_w.size * gen_w.dtype.itemsize)
    cost = pl.CostEstimate(
        flops=B * (2 * insize * 2 * z_dim + 2 * z_dim * outsize),
        transcendentals=B * (z_dim + 1),
        bytes_accessed=w_bytes + B * (insize + z_dim + outsize) * 4)

    return pl.pallas_call(
        kernel,
        out_shape=jax.ShapeDtypeStruct((B, outsize), jnp.float32),
        grid_spec=pltpu.PrefetchScalarGridSpec(
            num_scalar_prefetch=0,
            grid=(B // block_b,),
            in_specs=[
                pl.BlockSpec((block_b, insize), lambda i: (i, 0)),
                pl.BlockSpec((block_b, z_dim), lambda i: (i, 0)),
                pl.BlockSpec(small_template.shape, lambda i: (0, 0)),
                pl.BlockSpec(enc_w.shape, lambda i: (0, 0)),
                pl.BlockSpec(gen_w.shape, lambda i: (0, 0)),
            ],
            out_specs=pl.BlockSpec((block_b, outsize), lambda i: (i, 0)),
        ),
        compiler_params=pltpu.CompilerParams(dimension_semantics=("parallel",)),
        cost_estimate=cost,
    )(task_contexts.astype(jnp.float32), z_signals.astype(jnp.float32),
      small_template, enc_w, gen_w)


# -----------------------------------------------------------------------------
# Pure-JAX reference
# -----------------------------------------------------------------------------
def _reference_forward(task_context, enc_w, enc_b, gen_w, gen_b, z_signal):
    z_dim = gen_w.shape[1]
    outsize = gen_w.shape[0]
    dist = task_context @ enc_w.T + enc_b
    mu = dist[:z_dim]
    log_var = dist[z_dim:]
    z = mu[None, :] + jnp.exp(log_var / 2.0)[None, :] * z_signal
    wb = z @ gen_w.T + gen_b
    w = wb[:, :outsize]
    return w / jnp.linalg.norm(w)


if __name__ == "__main__":
    # Small, module-consistent shapes: insize = outsize = trans_linear_in_dim = 128,
    # z_dim = 64 (module default).
    insize = 128
    outsize = 128
    z_dim = 64

    key = jax.random.PRNGKey(0)
    k_x, k_ew, k_eb, k_gw, k_gb, k_z, k_xb, k_zb = jax.random.split(key, 8)

    # nn.Linear-style uniform(-1/sqrt(fan_in), 1/sqrt(fan_in)) init.
    enc_bound = 1.0 / (insize ** 0.5)
    gen_bound = 1.0 / (z_dim ** 0.5)
    enc_w = jax.random.uniform(k_ew, (2 * z_dim, insize), jnp.float32, -enc_bound, enc_bound)
    enc_b = jax.random.uniform(k_eb, (2 * z_dim,), jnp.float32, -enc_bound, enc_bound)
    gen_w = jax.random.uniform(k_gw, (outsize, z_dim), jnp.float32, -gen_bound, gen_bound)
    gen_b = jax.random.uniform(k_gb, (outsize,), jnp.float32, -gen_bound, gen_bound)

    task_context = jax.random.normal(k_x, (insize,), jnp.float32)
    # torch.randn(1, z_dim) noise, made deterministic and passed as an input.
    z_signal = jax.random.normal(k_z, (1, z_dim), jnp.float32)

    ref = _reference_forward(task_context, enc_w, enc_b, gen_w, gen_b, z_signal)

    # --- Single-context, f32 weights (bit-accurate path) ---
    p_f32 = prepare_generator_params(enc_w, enc_b, gen_w, gen_b, weights_dtype=jnp.float32)
    out = jax.block_until_ready(generator_forward(task_context, z_signal, *p_f32))
    assert out.shape == (1, outsize)
    assert jnp.allclose(out, ref, atol=1e-5, rtol=1e-5)

    # --- Single-context, bf16 weights (v6e/v7x MXU fast path, f32 accumulation) ---
    p_bf16 = prepare_generator_params(enc_w, enc_b, gen_w, gen_b, weights_dtype=jnp.bfloat16)
    out_bf16 = jax.block_until_ready(generator_forward(task_context, z_signal, *p_bf16))
    # ref is unit-L2-norm, so this is a relative L2 error check.
    assert jnp.linalg.norm(out_bf16 - ref) < 3e-2

    # --- Batched path (B contexts, "parallel" grid axis; megacore-shardable on v7x) ---
    B = 8
    xb = jax.random.normal(k_xb, (B, insize), jnp.float32)
    zb = jax.random.normal(k_zb, (B, z_dim), jnp.float32)
    outb = jax.block_until_ready(generator_forward_batched(xb, zb, *p_f32, block_b=8))
    refb = jax.vmap(
        lambda x, z: _reference_forward(x, enc_w, enc_b, gen_w, gen_b, z[None, :])[0]
    )(xb, zb)
    assert outb.shape == (B, outsize)
    assert jnp.allclose(outb, refb, atol=1e-5, rtol=1e-5)

    print("KERNEL_OK")
</pallas_src>

<mosaic_0001>
module attributes {stable_mosaic.version = 11 : i64} {
  func.func @_generator_kernel(%arg0: memref<8x128xf32, #tpu.memory_space<vmem>>, %arg1: memref<128x128xf32, #tpu.memory_space<vmem>>, %arg2: memref<128x64xf32, #tpu.memory_space<vmem>>, %arg3: memref<1x128xf32, #tpu.memory_space<vmem>>) attributes {dimension_semantics = [], scalar_prefetch = 0 : i64, scratch_operands = 0 : i64, tpu.core_type = #tpu.core_type<tc>} {
    %c0 = arith.constant 0 : index
    %c0_0 = arith.constant 0 : index
    %0 = vector.load %arg0[%c0, %c0_0] : memref<8x128xf32, #tpu.memory_space<vmem>>, vector<1x128xf32>
    %c1 = arith.constant 1 : index
    %c0_1 = arith.constant 0 : index
    %1 = vector.load %arg0[%c1, %c0_1] : memref<8x128xf32, #tpu.memory_space<vmem>>, vector<1x64xf32>
    %c2 = arith.constant 2 : index
    %c0_2 = arith.constant 0 : index
    %2 = vector.load %arg0[%c2, %c0_2] : memref<8x128xf32, #tpu.memory_space<vmem>>, vector<1x128xf32>
    %c3 = arith.constant 3 : index
    %c0_3 = arith.constant 0 : index
    %3 = vector.load %arg0[%c3, %c0_3] : memref<8x128xf32, #tpu.memory_space<vmem>>, vector<1x128xf32>
    %c0_4 = arith.constant 0 : index
    %c0_5 = arith.constant 0 : index
    %4 = vector.load %arg1[%c0_4, %c0_5] : memref<128x128xf32, #tpu.memory_space<vmem>>, vector<128x128xf32>
    %cst = arith.constant dense<0.000000e+00> : vector<1x128xf32>
    %5 = tpu.matmul %0, %4, %cst {dimension_numbers = #tpu.dot_dimension_numbers<[1], [1], [0], [0], [0, 0, 1, 0], [], []>} : vector<1x128xf32>, vector<128x128xf32>, vector<1x128xf32> -> vector<1x128xf32>
    %6 = arith.addf %5, %2 : vector<1x128xf32>
    %7 = vector.extract_strided_slice %6 {offsets = [0, 0], sizes = [1, 64], strides = [1, 1]} : vector<1x128xf32> to vector<1x64xf32>
    %8 = vector.extract_strided_slice %6 {offsets = [0, 64], sizes = [1, 64], strides = [1, 1]} : vector<1x128xf32> to vector<1x64xf32>
    %cst_6 = arith.constant 5.000000e-01 : f32
    %9 = vector.broadcast %cst_6 : f32 to vector<1x64xf32>
    %10 = arith.mulf %8, %9 : vector<1x64xf32>
    %11 = math.exp %10 : vector<1x64xf32>
    %12 = arith.mulf %11, %1 : vector<1x64xf32>
    %13 = arith.addf %7, %12 : vector<1x64xf32>
    %c0_7 = arith.constant 0 : index
    %c0_8 = arith.constant 0 : index
    %14 = vector.load %arg2[%c0_7, %c0_8] : memref<128x64xf32, #tpu.memory_space<vmem>>, vector<128x64xf32>
    %cst_9 = arith.constant dense<0.000000e+00> : vector<1x128xf32>
    %15 = tpu.matmul %13, %14, %cst_9 {dimension_numbers = #tpu.dot_dimension_numbers<[1], [1], [0], [0], [0, 0, 1, 0], [], []>} : vector<1x64xf32>, vector<128x64xf32>, vector<1x128xf32> -> vector<1x128xf32>
    %16 = arith.addf %15, %3 : vector<1x128xf32>
    %17 = arith.mulf %16, %16 : vector<1x128xf32>
    %18 = vector.shape_cast %17 : vector<1x128xf32> to vector<1x1x128xf32>
    %cst_10 = arith.constant dense<0.000000e+00> : vector<1xf32>
    %19 = vector.multi_reduction <add>, %18, %cst_10 [1, 2] : vector<1x1x128xf32> to vector<1xf32>
    %20 = vector.shape_cast %19 : vector<1xf32> to vector<1x1x1xf32>
    %21 = vector.extract %20[0, 0, 0] : f32 from vector<1x1x1xf32>
    %22 = math.rsqrt %21 : f32
    %23 = vector.broadcast %22 : f32 to vector<1x128xf32>
    %24 = arith.mulf %16, %23 : vector<1x128xf32>
    %c0_11 = arith.constant 0 : index
    %c0_12 = arith.constant 0 : index
    %25 = vector.load %arg3[%c0_11, %c0_12] : memref<1x128xf32, #tpu.memory_space<vmem>>, vector<1x128xf32>
    tpu.vector_store %arg3[%c0_11, %c0_12], %24 {strides = array<i32>} : memref<1x128xf32, #tpu.memory_space<vmem>>, vector<1x128xf32>,
    return
  }
}

</mosaic_0001>

<bundles_post_ra>
// kernel: generator_forward.1
= control target key start
LH: loop header
LB: loop body
LE: loop exit
PB: predicated region body
PF: predicated region fallthrough
CT: control target
= control target key end

     0   :  { %v443_v1 = vmov 0.0   ;;  %vm444_vm0 = vmmov 0   ;;  %s445_s18 = smov 64   ;;  %s631_s0 = inlined_call_operand.vmem [shape: f32[8,128], index: 0, kind: input, shape index: {}]   ;;  %s632_s1 = inlined_call_operand.vmem [shape: f32[128,128], index: 1, kind: input, shape index: {}]   ;;  %s633_s2 = inlined_call_operand.vmem [shape: f32[128,64], index: 2, kind: input, shape index: {}]   ;;  %s634_s3 = inlined_call_operand.hbm [shape: f32[1,128], index: 3, kind: output, shape index: {}]  }
   0x1   :  { %v34_v0 = vld [vmem:[%s632_s1 + $0x78] sm:$0xff]  ;;  %339 = vmatprep.subr.mxu0 %v443_v1  ;;  %371 = vmatprep.mubr.msk.f32.mxu0 %vm444_vm0, %v443_v1  ;;  %v33_v2 = vld [vmem:[%s632_s1 + $0x70] sm:$0xff]  ;;  %v16_v3 = vld [vmem:[%s631_s0 + $0x1] sm:$0x1] }
   0x2   :  { %340 = vmatpush3.xpose.msra.mxu0 %v34_v0  ;;  %374 = vmatprep.subr.mxu1 %v443_v1 }
   0x3   :  { %341 = vmatprep.subr.mxu0 %v443_v1  ;;  %406 = vmatprep.mubr.msk.f32.mxu1 %vm444_vm0, %v443_v1 }
   0x4   :  { %109 = vrot.lane.b32.xlu0 %v16_v3, %s445_s18 }
   0x6   :  { %342 = vmatpush3.xpose.msra.mxu0 %v33_v2 }
   0x7   :  { %8 = vsyncpa [#allocation3], 0  ;;  %343 = vmatprep.subr.mxu0 %v443_v1  ;;  %v32_v4 = vld [vmem:[%s632_s1 + $0x68] sm:$0xff]  ;;  %v31_v5 = vld [vmem:[%s632_s1 + $0x60] sm:$0xff]  ;;  %vm134_vm1 = vcmask 523264   ;;  %vm257_vm2 = vcmask 1040384  }
   0x8   :  { %v30_v6 = vld [vmem:[%s632_s1 + $0x58] sm:$0xff]  ;;  %v29_v7 = vld [vmem:[%s632_s1 + $0x50] sm:$0xff]  ;;  %v28_v8 = vld [vmem:[%s632_s1 + $0x48] sm:$0xff] }
   0x9   :  { %v27_v9 = vld [vmem:[%s632_s1 + $0x40] sm:$0xff]  ;;  %v26_v10 = vld [vmem:[%s632_s1 + $0x38] sm:$0xff]  ;;  %v25_v11 = vld [vmem:[%s632_s1 + $0x30] sm:$0xff] }
   0xa   :  { %344 = vmatpush3.xpose.msra.mxu0 %v32_v4  ;;  %v24_v12 = vld [vmem:[%s632_s1 + $0x28] sm:$0xff]  ;;  %v23_v13 = vld [vmem:[%s632_s1 + $0x20] sm:$0xff]  ;;  %v22_v14 = vld [vmem:[%s632_s1 + $0x18] sm:$0xff] }
   0xb   :  { %345 = vmatprep.subr.mxu0 %v443_v1  ;;  %v21_v15 = vld [vmem:[%s632_s1 + $0x10] sm:$0xff]  ;;  %v20_v16 = vld [vmem:[%s632_s1 + $0x8] sm:$0xff]  ;;  %v19_v17 = vld [vmem:[%s632_s1] sm:$0xff] }
   0xc   :  { %v15_v18 = vld [vmem:[%s631_s0] sm:$0x1]  ;;  %v133_v19 = vld [vmem:[%s633_s2 + $0x78] sm:$0xff]  ;;  %v132_v20 = vld [vmem:[%s633_s2 + $0x70] sm:$0xff] }
   0xd   :  { %375 = vmatpush3.xpose.msk.msra.mxu1 %vm134_vm1, %v133_v19  ;;  %v131_v21 = vld [vmem:[%s633_s2 + $0x68] sm:$0xff]  ;;  %v130_v22 = vld [vmem:[%s633_s2 + $0x60] sm:$0xff]  ;;  %v129_v23 = vld [vmem:[%s633_s2 + $0x58] sm:$0xff] }
   0xe   :  { %346 = vmatpush3.xpose.msra.mxu0 %v31_v5  ;;  %376 = vmatprep.subr.mxu1 %v443_v1  ;;  %v128_v24 = vld [vmem:[%s633_s2 + $0x50] sm:$0xff]  ;;  %v127_v25 = vld [vmem:[%s633_s2 + $0x48] sm:$0xff]  ;;  %v126_v26 = vld [vmem:[%s633_s2 + $0x40] sm:$0xff] }
   0xf   :  { %347 = vmatprep.subr.mxu0 %v443_v1  ;;  %v125_v27 = vld [vmem:[%s633_s2 + $0x38] sm:$0xff]  ;;  %v124_v28 = vld [vmem:[%s633_s2 + $0x30] sm:$0xff]  ;;  %v123_v29 = vld [vmem:[%s633_s2 + $0x28] sm:$0xff] }
  0x10   :  { %v122_v30 = vld [vmem:[%s633_s2 + $0x20] sm:$0xff]  ;;  %v121_v31 = vld [vmem:[%s633_s2 + $0x18] sm:$0xff]  ;;  %v120_v32 = vld [vmem:[%s633_s2 + $0x10] sm:$0xff] }
  0x11   :  { %377 = vmatpush3.xpose.msk.msra.mxu1 %vm134_vm1, %v132_v20  ;;  %v119_v33 = vld [vmem:[%s633_s2 + $0x8] sm:$0xff]  ;;  %v118_v34 = vld [vmem:[%s633_s2] sm:$0xff] }
  0x12   :  { %348 = vmatpush3.xpose.msra.mxu0 %v30_v6  ;;  %378 = vmatprep.subr.mxu1 %v443_v1  ;;  %v17_v35 = vld [vmem:[%s631_s0 + $0x2] sm:$0x1]  ;;  %v18_v46 = vld [vmem:[%s631_s0 + $0x3] sm:$0x1]  ;;  %s446_s0 = smov [#allocation2]  }
  0x13   :  { %349 = vmatprep.subr.mxu0 %v443_v1  ;;  %s280_s30 = sshll.u32 %s446_s0, 4  ;;  %s281_s30 = int_to_ptr.vmem [resolvable:$true] %s280_s30 }
  0x14   :  { %s421_s5 = scalar_lea.vmem %s281_s30, 16  ;;  %s425_s6 = scalar_lea.vmem %s281_s30, 32 }
  0x15   :  { %379 = vmatpush3.xpose.msk.msra.mxu1 %vm134_vm1, %v131_v21  ;;  %p422_p0 = scmp.ne.s32.totalorder %s281_s30, %s421_s5  ;;  %p426_p1 = scmp.lt.s32.totalorder %s281_s30, %s281_s30 }
  0x16   :  { %350 = vmatpush3.xpose.msra.mxu0 %v29_v7  ;;  %380 = vmatprep.subr.mxu1 %v443_v1  ;;  %p427_p2 = scmp.lt.s32.totalorder %s425_s6, %s421_s5 }
  0x17   :  { %351 = vmatprep.subr.mxu0 %v443_v1 }
  0x18   :  { %p428_p3 = por %p427_p2, %p426_p1 }
  0x19   :  { %381 = vmatpush3.xpose.msk.msra.mxu1 %vm134_vm1, %v130_v22 }
  0x1a   :  { %352 = vmatpush3.xpose.msra.mxu0 %v28_v8  ;;  %382 = vmatprep.subr.mxu1 %v443_v1  ;;  %p429_p4 = pnand %p428_p3, %p422_p0 }
  0x1b   :  { %353 = vmatprep.subr.mxu0 %v443_v1 }
  0x1d   :  { %383 = vmatpush3.xpose.msk.msra.mxu1 %vm134_vm1, %v129_v23 }
  0x1e   :  { %354 = vmatpush3.xpose.msra.mxu0 %v27_v9  ;;  %384 = vmatprep.subr.mxu1 %v443_v1 }
  0x1f   :  { %355 = vmatprep.subr.mxu0 %v443_v1 }
  0x21   :  { %385 = vmatpush3.xpose.msk.msra.mxu1 %vm134_vm1, %v128_v24 }
  0x22   :  { %356 = vmatpush3.xpose.msra.mxu0 %v26_v10  ;;  %386 = vmatprep.subr.mxu1 %v443_v1 }
  0x23   :  { %357 = vmatprep.subr.mxu0 %v443_v1 }
  0x25   :  { %387 = vmatpush3.xpose.msk.msra.mxu1 %vm134_vm1, %v127_v25 }
  0x26   :  { %358 = vmatpush3.xpose.msra.mxu0 %v25_v11  ;;  %388 = vmatprep.subr.mxu1 %v443_v1 }
  0x27   :  { %359 = vmatprep.subr.mxu0 %v443_v1 }
  0x29   :  { %389 = vmatpush3.xpose.msk.msra.mxu1 %vm134_vm1, %v126_v26 }
  0x2a   :  { %360 = vmatpush3.xpose.msra.mxu0 %v24_v12  ;;  %390 = vmatprep.subr.mxu1 %v443_v1 }
  0x2b   :  { %361 = vmatprep.subr.mxu0 %v443_v1 }
  0x2d   :  { %391 = vmatpush3.xpose.msk.msra.mxu1 %vm134_vm1, %v125_v27 }
  0x2e   :  { %362 = vmatpush3.xpose.msra.mxu0 %v23_v13  ;;  %392 = vmatprep.subr.mxu1 %v443_v1 }
  0x2f   :  { %363 = vmatprep.subr.mxu0 %v443_v1 }
  0x31   :  { %393 = vmatpush3.xpose.msk.msra.mxu1 %vm134_vm1, %v124_v28 }
  0x32   :  { %364 = vmatpush3.xpose.msra.mxu0 %v22_v14  ;;  %394 = vmatprep.subr.mxu1 %v443_v1 }
  0x33   :  { %365 = vmatprep.subr.mxu0 %v443_v1 }
  0x35   :  { %395 = vmatpush3.xpose.msk.msra.mxu1 %vm134_vm1, %v123_v29 }
  0x36   :  { %366 = vmatpush3.xpose.msra.mxu0 %v21_v15  ;;  %396 = vmatprep.subr.mxu1 %v443_v1 }
  0x37   :  { %367 = vmatprep.subr.mxu0 %v443_v1 }
  0x39   :  { %397 = vmatpush3.xpose.msk.msra.mxu1 %vm134_vm1, %v122_v30 }
  0x3a   :  { %368 = vmatpush3.xpose.msra.mxu0 %v20_v16  ;;  %398 = vmatprep.subr.mxu1 %v443_v1 }
  0x3b   :  { %369 = vmatprep.subr.mxu0 %v443_v1 }
  0x3d   :  { %399 = vmatpush3.xpose.msk.msra.mxu1 %vm134_vm1, %v121_v31 }
  0x3e   :  { %370 = vmatpush3.xpose.msra.mxu0 %v19_v17  ;;  %400 = vmatprep.subr.mxu1 %v443_v1 }
  0x41   :  { %372 = vmatmul.mubr.f32.vlgmr.msra.gmra.mxu0 %v15_v18  ;;  %401 = vmatpush3.xpose.msk.msra.mxu1 %vm134_vm1, %v120_v32 }
  0x42   :  { %402 = vmatprep.subr.mxu1 %v443_v1 }
  0x45   :  { %403 = vmatpush3.xpose.msk.msra.mxu1 %vm134_vm1, %v119_v33 }
  0x46   :  { %404 = vmatprep.subr.mxu1 %v443_v1 }
  0x49   :  { %405 = vmatpush3.xpose.msk.msra.mxu1 %vm134_vm1, %v118_v34 }
  0x76   :  { %v110_v41 = vpop.permute.xlu0 %109 }
 0x101   :  { %v101_v36 = vpop.f32.mrf.mxu0 }
 0x102   :  { %v102_v37 = vadd.f32 %v101_v36, %v17_v35 }
 0x103   :  { %v373_v38 = vpop.f32.mrf.mxu0 }
 0x104   :  { %v105_v39 = vmul.f32 0.5, %v102_v37 }
 0x106   :  { %v106_v40 = vmul.f32 1.442695, %v105_v39 }
 0x108   :  { %417 = vpow2.f32 %v106_v40 }
 0x115   :  { %v418_v42 = vpop.eup %417 }
 0x116   :  { %v112_v43 = vmul.f32 %v418_v42, %v110_v41 }
 0x118   :  { %114 = vrot.lane.b32.xlu0 %v112_v43, %s445_s18 }
 0x18a   :  { %v115_v44 = vpop.permute.xlu0 %114 }
 0x18b   :  { %v117_v45 = vadd.f32 %v115_v44, %v102_v37 }
 0x18d   :  { %407 = vmatmul.mubr.msk.f32.vlgmr.msra.gmra.mxu1 %vm134_vm1, %v117_v45 }
 0x24d   :  { %v252_v47 = vpop.f32.mrf.mxu1 }
 0x24e   :  { %v253_v48 = vadd.f32 %v252_v47, %v18_v46 }
 0x24f   :  { %v408_v49 = vpop.f32.mrf.mxu1 }
 0x250   :  { %v256_v50 = vmul.f32 %v253_v48, %v253_v48 }
 0x252   :  { %v258_v51 = vsel %vm257_vm2, %v256_v50, 0.0 }
 0x253   :  { %259 = vadd.xlane.f32.xlu1 %v258_v51 }
 0x2dc   :  { %v260_v52 = vpop.xlane.xlu1 %259 }
 0x2dd   :  { %v261_v53 = vrot.slane %v260_v52, 4 }
 0x2df   :  { %v262_v54 = vadd.f32 %v261_v53, %v260_v52 }
 0x2e1   :  { %v263_v55 = vrot.slane %v262_v54, 2 }
 0x2e3   :  { %v264_v56 = vadd.f32 %v263_v55, %v262_v54 }
 0x2e5   :  { %v265_v57 = vrot.slane %v264_v56, 1 }
 0x2e7   :  { %v266_v58 = vadd.f32 %v265_v57, %v264_v56 }
 0x2e9   :  { %409 = vpush %v266_v58 }
 0x31a   :  { %s410_s18 = spop %409 }
 0x31b   :  { %v268_v59 = vstv %s410_s18 }
 0x31c   :  { %419 = vrsqrt.f32 %v268_v59 }
 0x329   :  { %v420_v60 = vpop.eup %419 }
 0x32a   :  { %411 = vpush %v420_v60 }
 0x35b   :  { %s412_s4 = spop %411 }
 0x35c   :  { %v271_v61 = vstv %s412_s4 }
 0x35d   :  { %v272_v62 = vmul.f32 %v271_v61, %v253_v48 }
 0x35f   :  { %273 = vst [vmem:[#allocation2] sm:$0x1] %v272_v62 }
 0x360   :  { %432 = shalt.err (!%p429_p4)
}
 0x361   :  { %283 = dma.vmem_to_hbm [thread:$0]  %s281_s30, 16, %s634_s3, [#allocation3]  }
 0x362   :  { %441 = dma.done.wait [#allocation3], 16  }
 0x363   :  { %442 = vsyncadd [#allocation3], 4294967280 }
 0x364   :  { %287 = vsyncpa [#allocation3], 1 }

</bundles_post_ra>
